<compile_context>
chip_gen: v6e
topology: v6e:2x2x1
jax: 0.10.0
libtpu: 0.0.40
codegen_flags: <defaults>
</compile_context>

<pallas_src>
import math

import jax
import jax.numpy as jnp
from jax import lax
from jax.experimental import pallas as pl
from jax.experimental.pallas import tpu as pltpu


# ------------------------------ tiling helper -------------------------------

def _pick_tile(dim, candidates):
    """Largest candidate that evenly divides `dim`, else the full dim
    (a full-extent block is always a legal BlockSpec shape)."""
    for c in candidates:
        if dim >= c and dim % c == 0:
            return c
    return dim


# ------------------------- 1x1-conv (matmul) kernels -------------------------

def _conv1x1_kernel(w_ref, x_ref, o_ref, acc_ref):
    # w: (to, tk), x: (tk, tn), o: (to, tn); contraction axis is grid axis 3.
    @pl.when(pl.program_id(3) == 0)
    def _init():
        acc_ref[...] = jnp.zeros_like(acc_ref)

    acc_ref[...] += jnp.dot(w_ref[...], x_ref[...],
                            preferred_element_type=jnp.float32)

    @pl.when(pl.program_id(3) == pl.num_programs(3) - 1)
    def _store():
        o_ref[...] = acc_ref[...].astype(o_ref.dtype)


def _conv1x1_bias_kernel(w_ref, x_ref, b_ref, o_ref, acc_ref):
    @pl.when(pl.program_id(3) == 0)
    def _init():
        acc_ref[...] = jnp.zeros_like(acc_ref)

    acc_ref[...] += jnp.dot(w_ref[...], x_ref[...],
                            preferred_element_type=jnp.float32)

    @pl.when(pl.program_id(3) == pl.num_programs(3) - 1)
    def _store():
        o_ref[...] = (acc_ref[...] + b_ref[...].astype(jnp.float32)
                      ).astype(o_ref.dtype)


def conv1x1(x3d, w, b=None):
    """1x1 conv in channel-major layout.

    x3d: (B, C, N) with N = H*W, w: (O, C), b: (O,) or None -> (B, O, N)
    out[b, o, n] = sum_c w[o, c] * x[b, c, n] (+ b[o])
    """
    B, C, N = x3d.shape
    O = w.shape[0]
    to = _pick_tile(O, (256, 128, 64, 32, 16, 8))   # sublane axis: mult of 8 or full
    tn = _pick_tile(N, (1024, 512, 256, 128))       # lane axis: mult of 128 or full
    tk = _pick_tile(C, (512, 256, 128))             # contraction axis
    grid = (B, O // to, N // tn, C // tk)

    w_spec = pl.BlockSpec((to, tk), lambda b_, i, j, k: (i, k))
    x_spec = pl.BlockSpec((None, tk, tn), lambda b_, i, j, k: (b_, k, j))
    o_spec = pl.BlockSpec((None, to, tn), lambda b_, i, j, k: (b_, i, j))

    if b is None:
        kernel = _conv1x1_kernel
        in_specs = [w_spec, x_spec]
        args = (w, x3d)
    else:
        kernel = _conv1x1_bias_kernel
        in_specs = [w_spec, x_spec,
                    pl.BlockSpec((to, 1), lambda b_, i, j, k: (i, 0))]
        args = (w, x3d, b.reshape(O, 1))

    return pl.pallas_call(
        kernel,
        out_shape=jax.ShapeDtypeStruct((B, O, N), x3d.dtype),
        grid_spec=pltpu.PrefetchScalarGridSpec(
            num_scalar_prefetch=0,
            grid=grid,
            in_specs=in_specs,
            out_specs=o_spec,
            scratch_shapes=[pltpu.VMEM((to, tn), jnp.float32)],
        ),
        compiler_params=pltpu.CompilerParams(
            dimension_semantics=("parallel", "parallel", "parallel", "arbitrary"),
        ),
    )(*args)


# --------------------------- linear-attention core ---------------------------

def _linear_attn_kernel(q_ref, k_ref, v_ref, o_ref):
    """One (batch, head): refs are (dim_head, N) views in channel-major layout."""
    q = q_ref[...]                          # MXU operands stay in input dtype
    v = v_ref[...]
    k = k_ref[...].astype(jnp.float32)      # softmax statistics in f32

    m = jnp.max(k, axis=-1, keepdims=True)                         # (d, 1)
    p = jnp.exp(k - m)                                             # (d, n)
    inv_l = pl.reciprocal(jnp.sum(p, axis=-1, keepdims=True))      # exact recip
    k_soft = (p * inv_l).astype(v.dtype)                           # softmax over n

    # context^T[e, d] = sum_n v[e, n] * softmax(k)[d, n]   (A @ B^T form)
    ctx_t = lax.dot_general(v, k_soft, (((1,), (1,)), ((), ())),
                            preferred_element_type=jnp.float32)    # (e, d)
    # out[e, n] = sum_d context[d, e] * q[d, n] = context^T @ q
    out = jnp.dot(ctx_t.astype(q.dtype), q,
                  preferred_element_type=jnp.float32)              # (e, n)
    o_ref[...] = out.astype(o_ref.dtype)


def linear_attention(qkv, heads, dim_head):
    """qkv: (B, 3*heads*dim_head, N) channel-major -> (B, heads*dim_head, N).

    Heads are sliced out of the fused qkv tensor by the BlockSpec index_maps,
    so no q/k/v split, reshape or transpose is ever materialized in HBM.
    """
    B, C3, N = qkv.shape
    d, H = dim_head, heads
    assert C3 == 3 * H * d
    assert d % 8 == 0, "dim_head must be a multiple of 8 for TPU sublane tiling"

    blk = (None, d, N)   # lane-dense output: last dim is the full spatial extent
    # TODO(synk): for very large H*W, add a spatial grid axis with a two-pass /
    # online-softmax accumulation; the per-head footprint here is linear in H*W.
    return pl.pallas_call(
        _linear_attn_kernel,
        out_shape=jax.ShapeDtypeStruct((B, H * d, N), qkv.dtype),
        grid=(B, H),
        in_specs=[
            pl.BlockSpec(blk, lambda b, h: (b, h, 0)),            # q, head h
            pl.BlockSpec(blk, lambda b, h: (b, H + h, 0)),        # k, head h
            pl.BlockSpec(blk, lambda b, h: (b, 2 * H + h, 0)),    # v, head h
        ],
        out_specs=pl.BlockSpec(blk, lambda b, h: (b, h, 0)),
        compiler_params=pltpu.CompilerParams(
            dimension_semantics=("parallel", "parallel"),
        ),
    )(qkv, qkv, qkv)


# ----------------------------- module equivalent -----------------------------

class LinearAttentionPallas:
    """JAX/Pallas equivalent of sgm.modules.attention.LinearAttention."""

    def __init__(self, dim, heads=4, dim_head=32, key=None):
        self.dim = dim
        self.heads = heads
        self.dim_head = dim_head
        hidden = heads * dim_head
        self.hidden = hidden

        key = jax.random.PRNGKey(42) if key is None else key
        k1, k2, k3 = jax.random.split(key, 3)
        # torch Conv2d(1x1) default init: U(-1/sqrt(fan_in), 1/sqrt(fan_in)).
        bq = 1.0 / math.sqrt(dim)
        self.w_qkv = jax.random.uniform(k1, (3 * hidden, dim), jnp.float32,
                                        minval=-bq, maxval=bq)
        bo = 1.0 / math.sqrt(hidden)
        self.w_out = jax.random.uniform(k2, (dim, hidden), jnp.float32,
                                        minval=-bo, maxval=bo)
        self.b_out = jax.random.uniform(k3, (dim,), jnp.float32,
                                        minval=-bo, maxval=bo)

    def __call__(self, x):
        B, C, Hs, Ws = x.shape
        n = Hs * Ws
        xf = x.reshape(B, C, n)                        # free reshape: NCHW -> NC(HW)
        qkv = conv1x1(xf, self.w_qkv)                  # fused q/k/v projection
        out = linear_attention(qkv, self.heads, self.dim_head)
        out = conv1x1(out, self.w_out, self.b_out)     # to_out (1x1 conv + bias)
        return out.reshape(B, self.dim, Hs, Ws)


# ------------------------------ reference (jnp) -------------------------------

def reference(mod, x):
    B, C, Hs, Ws = x.shape
    n = Hs * Ws
    xf = x.reshape(B, C, n)
    qkv = jnp.einsum("oc,bcn->bon", mod.w_qkv, xf)
    q, k, v = [t.reshape(B, mod.heads, mod.dim_head, n)
               for t in jnp.split(qkv, 3, axis=1)]
    k = jax.nn.softmax(k, axis=-1)
    context = jnp.einsum("bhdn,bhen->bhde", k, v)
    out = jnp.einsum("bhde,bhdn->bhen", context, q)
    out = out.reshape(B, mod.heads * mod.dim_head, n)
    out = jnp.einsum("oc,bcn->bon", mod.w_out, out) + mod.b_out[None, :, None]
    return out.reshape(B, mod.dim, Hs, Ws)


# ----------------------------------- main -------------------------------------

if __name__ == "__main__":
    key = jax.random.PRNGKey(0)

    B, dim, Hs, Ws = 2, 32, 16, 16
    heads, dim_head = 4, 32

    x = jax.random.normal(key, (B, dim, Hs, Ws), jnp.float32)

    attn = LinearAttentionPallas(dim, heads=heads, dim_head=dim_head,
                                 key=jax.random.PRNGKey(42))

    out = attn(x)
    out = jax.block_until_ready(out)

    ref = reference(attn, x)
    assert out.shape == (B, dim, Hs, Ws), out.shape
    assert jnp.allclose(out, ref, atol=1e-4, rtol=1e-4), \
        float(jnp.max(jnp.abs(out - ref)))

    print("KERNEL_OK")
</pallas_src>

<mosaic_0001>
module attributes {stable_mosaic.version = 11 : i64} {
  func.func @_conv1x1_kernel(%arg0: i32, %arg1: i32, %arg2: i32, %arg3: i32, %arg4: memref<128x32xf32, #tpu.memory_space<vmem>>, %arg5: memref<1x32x256xf32, #tpu.memory_space<vmem>>, %arg6: memref<1x128x256xf32, #tpu.memory_space<vmem>>, %arg7: memref<128x256xf32, #tpu.memory_space<vmem>>) attributes {dimension_semantics = [#tpu.dimension_semantics<parallel>, #tpu.dimension_semantics<parallel>, #tpu.dimension_semantics<parallel>, #tpu.dimension_semantics<arbitrary>], iteration_bounds = array<i64: 2, 3, 1, 1>, scalar_prefetch = 0 : i64, scratch_operands = 1 : i64, tpu.core_type = #tpu.core_type<tc>, window_params = [{transform_indices = @transform_0, window_bounds = array<i64: 128, 32>}, {transform_indices = @transform_1, window_bounds = array<i64: 1, 32, 256>}, {transform_indices = @transform_2, window_bounds = array<i64: 1, 128, 256>}]} {
    %c0_i32 = arith.constant 0 : i32
    %0 = arith.cmpi eq, %arg3, %c0_i32 : i32
    %1 = arith.extui %0 : i1 to i32
    %c0_i32_0 = arith.constant 0 : i32
    %2 = arith.cmpi ne, %1, %c0_i32_0 : i32
    scf.if %2 {
      %cst_11 = arith.constant 0.000000e+00 : f32
      %13 = vector.broadcast %cst_11 : f32 to vector<128x256xf32>
      %c0_12 = arith.constant 0 : index
      %c0_13 = arith.constant 0 : index
      %14 = vector.load %arg7[%c0_12, %c0_13] : memref<128x256xf32, #tpu.memory_space<vmem>>, vector<128x256xf32>
      tpu.vector_store %arg7[%c0_12, %c0_13], %13 {strides = array<i32>} : memref<128x256xf32, #tpu.memory_space<vmem>>, vector<128x256xf32>,
    } else {
    }
    %c0 = arith.constant 0 : index
    %c0_1 = arith.constant 0 : index
    %3 = vector.load %arg7[%c0, %c0_1] : memref<128x256xf32, #tpu.memory_space<vmem>>, vector<128x256xf32>
    %c0_2 = arith.constant 0 : index
    %c0_3 = arith.constant 0 : index
    %4 = vector.load %arg4[%c0_2, %c0_3] : memref<128x32xf32, #tpu.memory_space<vmem>>, vector<128x32xf32>
    %c0_4 = arith.constant 0 : index
    %c0_5 = arith.constant 0 : index
    %c0_6 = arith.constant 0 : index
    %5 = vector.load %arg5[%c0_4, %c0_5, %c0_6] : memref<1x32x256xf32, #tpu.memory_space<vmem>>, vector<1x32x256xf32>
    %6 = vector.shape_cast %5 : vector<1x32x256xf32> to vector<32x256xf32>
    %cst = arith.constant dense<0.000000e+00> : vector<128x256xf32>
    %7 = tpu.matmul %4, %6, %cst {dimension_numbers = #tpu.dot_dimension_numbers<[1], [0], [0], [1], [0, 0, 1, 1], [], []>} : vector<128x32xf32>, vector<32x256xf32>, vector<128x256xf32> -> vector<128x256xf32>
    %8 = arith.addf %3, %7 : vector<128x256xf32>
    %c0_7 = arith.constant 0 : index
    %c0_8 = arith.constant 0 : index
    %9 = vector.load %arg7[%c0_7, %c0_8] : memref<128x256xf32, #tpu.memory_space<vmem>>, vector<128x256xf32>
    tpu.vector_store %arg7[%c0_7, %c0_8], %8 {strides = array<i32>} : memref<128x256xf32, #tpu.memory_space<vmem>>, vector<128x256xf32>,
    %c0_i32_9 = arith.constant 0 : i32
    %10 = arith.cmpi eq, %arg3, %c0_i32_9 : i32
    %11 = arith.extui %10 : i1 to i32
    %c0_i32_10 = arith.constant 0 : i32
    %12 = arith.cmpi ne, %11, %c0_i32_10 : i32
    scf.if %12 {
      %c0_11 = arith.constant 0 : index
      %c0_12 = arith.constant 0 : index
      %13 = vector.load %arg7[%c0_11, %c0_12] : memref<128x256xf32, #tpu.memory_space<vmem>>, vector<128x256xf32>
      %c0_13 = arith.constant 0 : index
      %c0_14 = arith.constant 0 : index
      %c0_15 = arith.constant 0 : index
      %14 = vector.load %arg6[%c0_13, %c0_14, %c0_15] : memref<1x128x256xf32, #tpu.memory_space<vmem>>, vector<1x128x256xf32>
      %15 = vector.shape_cast %14 : vector<1x128x256xf32> to vector<128x256xf32>
      %16 = vector.shape_cast %13 : vector<128x256xf32> to vector<1x128x256xf32>
      tpu.vector_store %arg6[%c0_13, %c0_14, %c0_15], %16 {strides = array<i32>} : memref<1x128x256xf32, #tpu.memory_space<vmem>>, vector<1x128x256xf32>,
    } else {
    }
    return
  }
  func.func @transform_0(%arg0: i32, %arg1: i32, %arg2: i32, %arg3: i32) -> (i32, i32) {
    %c0_i32 = arith.constant 0 : i32
    return %arg1, %arg3 : i32, i32
  }
  func.func @transform_1(%arg0: i32, %arg1: i32, %arg2: i32, %arg3: i32) -> (i32, i32, i32) {
    %c0_i32 = arith.constant 0 : i32
    return %arg0, %arg3, %arg2 : i32, i32, i32
  }
  func.func @transform_2(%arg0: i32, %arg1: i32, %arg2: i32, %arg3: i32) -> (i32, i32, i32) {
    %c0_i32 = arith.constant 0 : i32
    return %arg0, %arg1, %arg2 : i32, i32, i32
  }
}

</mosaic_0001>

<bundles_post_ra>
// kernel: tpu_custom_call.1
= control target key start
LH: loop header
LB: loop body
LE: loop exit
PB: predicated region body
PF: predicated region fallthrough
CT: control target
= control target key end

     0   :  { %7 = vsyncpa [#allocation4], 0  ;;  %s1265_s0 = inlined_call_operand.vmem [shape: f32[384,32], index: 0, kind: input, shape index: {}]   ;;  %s1266_s1 = inlined_call_operand.vmem [shape: f32[2,32,256], index: 1, kind: input, shape index: {}]   ;;  %s1267_s2 = inlined_call_operand.hbm [shape: f32[2,384,256], index: 2, kind: output, shape index: {}]  }
   0x1   :  { %9 = vsyncpa [#allocation4 + $0x1], 0  ;;  %s1035_s9 = smov 0   ;;  %s1037_s10 = smov 0  }
   0x2   :  { %s1039_s11 = smov 0   ;;  %s1041_s12 = smov 0  }
   0x3   :  { %s1043_s13 = smov 0   ;;  %s1045_s14 = smov 0  }
   0x4   :  { %s1047_s15 = smov 0   ;;  %s1049_s16 = smov 0  }
   0x5 LB: > { %s805_s17 = sadd.s32 4294967295, %s1014_s16   ;;  %s806_s18 = sadd.s32 4294967294, %s1014_s16   ;;  %s1014_s16 = sphi %s1049_s16, %s15_s16   ;;  %s1010_s15 = sphi %s1047_s15, %s1276_s15   ;;  %s1006_s14 = sphi %s1045_s14, %s1275_s14   ;;  %s1002_s13 = sphi %s1043_s13, %s1274_s13   ;;  %s998_s12 = sphi %s1041_s12, %s1273_s12   ;;  %s994_s11 = sphi %s1039_s11, %s1272_s11   ;;  %s990_s10 = sphi %s1037_s10, %s1271_s10   ;;  %s986_s9 = sphi %s1035_s9, %s1270_s9  }
   0x6   : > { %s37_s19 = sadd.s32 1, %s1006_s14  ;;  %s41_s20 = sadd.s32 1, %s1010_s15 }
   0x7   : > { %p39_p0 = scmp.ge.s32.totalorder %s37_s19, 3  ;;  %p120_p1 = scmp.ne.s32.totalorder %s994_s11, %s990_s10 }
   0x8   : > { %p121_p2 = scmp.eq.s32.totalorder %s805_s17, 5  ;;  %p126_p5 = scmp.ne.s32.totalorder %s990_s10, %s986_s9 }
   0x9   : > { %s1278_s19 = smov (%p39_p0, %s37_s19), 0  ;;  %s1280_s20 = smov (!%p39_p0, %s41_s20), %s1010_s15 }
   0xa   : > { %s104_s21 = ssub.s32 %s1006_s14, %s1278_s19  ;;  %p1086_p3 = por %p121_p2, %p120_p1 }
   0xb   : > { %p43_p4 = scmp.ge.s32.totalorder %s1280_s20, 2  ;;  %p127_p6 = scmp.eq.s32.totalorder %s806_s18, 5 }
   0xc   : > { %p809_p7 = scmp.ge.s32.totalorder %s1014_s16, 1  ;;  %p176_p9 = scmp.lt.s32.totalorder %s1014_s16, 7 }
   0xd   : > { %s1282_s20 = smov (%p43_p4, %s1280_s20), 0  ;;  %p1095_p8 = por %p127_p6, %p126_p5 }
   0xe   : > { %s103_s24 = ssub.s32 %s1010_s15, %s1282_s20  ;;  %s110_s25 = sadd.s32 1, %s994_s11 }
   0xf   : > { %s105_s26 = sor.u32 %s104_s21, %s103_s24  ;;  %p177_p10 = pnand %p809_p7, %p176_p9 }
  0x10   : > { %p108_p11 = scmp.eq.s32.totalorder %s105_s26, 0  ;;  %p226_p12 = scmp.lt.s32.totalorder (!%p177_p10), %s1002_s13, 1 }
  0x11   : > { %180 = sbr.rel (%p177_p10) target bundleno = 272 (0x110), region = 28  ;;  %s811_s28 = sshll.u32 (!%p177_p10), %s998_s12, 4 }
  0x12   : > { %s1104_s27 = scalar_select %p108_p11, %s994_s11, %s110_s25  }
  0x13   : > { %p216_p13 = scmp.lt.s32.totalorder (!%p177_p10), %s811_s28, 47  ;;  %s212_s18 = sand.u32 (!%p177_p10), 1, %s990_s10  }
  0x14   : > { %s810_s21 = sshll.u32 (!%p177_p10), %s212_s18, 8  ;;  %s847_s25 = smul.u32 (!%p177_p10), 96, %s1002_s13 }
  0x15   : > { %s1168_s24 = scalar_lea.vmem (!%p177_p10), [#allocation3], %s810_s21  ;;  %s838_s26 = sshll.u32 (!%p177_p10), %s998_s12, 5 }
  0x16   : > { %v1016_v0 = vmov 0.0   ;;  %s227_s29 = scalar_select %p226_p12, %s1002_s13, 1  ;;  %vm334_vm0 = vcmask 261120  }
  0x17   : > { %447 = vmatprep.mubr.f32.mxu0 %v1016_v0  ;;  %495 = vmatprep.mubr.f32.mxu1 %v1016_v0  ;;  %s1284_s28 = smov (!%p216_p13, %s811_s28), 47  ;;  %s694_s13 = sshll.u32 %s1168_s24, 4  ;;  %s1206_s13 = int_to_ptr.vmem [resolvable:$true] %s694_s13 }
  0x18   : > { %s837_s30 = sshll.u32 %s227_s29, 6  ;;  %s812_s6 = sshll.u32 %s1284_s28, 3 }
  0x19   : > { %s237_s5 = scalar_lea.vmem %s1266_s1, %s837_s30  ;;  %s1117_s17 = scalar_lea.vmem %s1265_s0, %s812_s6 }
  0x1a   : > { %v333_v1 = vld [vmem:[%s237_s5 + $0x38] sm:$0xff]  ;;  %v332_v2 = vld [vmem:[%s237_s5 + $0x30] sm:$0xff]  ;;  %v331_v3 = vld [vmem:[%s237_s5 + $0x28] sm:$0xff]  ;;  %s691_s28 = sadd.s32 %s847_s25, %s838_s26  ;;  %s1214_s4 = scalar_lea.sflag [#allocation4], %s212_s18 }
  0x1b   : > { %407 = vmatprep.subr.mxu0 %v333_v1  ;;  %839 = vmatprep.subr.mxu1 %v333_v1  ;;  %v330_v4 = vld [vmem:[%s237_s5 + $0x20] sm:$0xff]  ;;  %v329_v5 = vld [vmem:[%s237_s5 + $0x18] sm:$0xff]  ;;  %v328_v6 = vld [vmem:[%s237_s5 + $0x10] sm:$0xff]  ;;  %s834_s12 = sshll.u32 %s691_s28, 7  ;;  %s1017_s6 = smov [#allocation3]  }
  0x1c   : > { %408 = vmatpush1.msra.mxu0 %v332_v2  ;;  %843 = vmatpush1.msra.mxu1 %v332_v2  ;;  %v327_v7 = vld [vmem:[%s237_s5 + $0x8] sm:$0xff]  ;;  %v326_v8 = vld [vmem:[%s237_s5] sm:$0xff]  ;;  %v312_v13 = vld [vmem:[%s1117_s17 + $0x10] sm:$0xff]  ;;  %s1204_s3 = scalar_lea.hbm %s1267_s2, %s834_s12  ;;  %s922_s5 = scalar_lea.vmem %s1206_s13, 4096 }
  0x1d   : > { %409 = vmatprep.subr.mxu0 %v331_v3  ;;  %840 = vmatprep.subr.mxu1 %v331_v3  ;;  %v310_v9 = vld [vmem:[%s1117_s17] sm:$0xff]  ;;  %v311_v11 = vld [vmem:[%s1117_s17 + $0x8] sm:$0xff]  ;;  %v320_v14 = vld [vmem:[%s1117_s17 + $0x50] sm:$0xff]  ;;  %p923_p0 = scmp.ne.s32.totalorder %s1206_s13, %s922_s5  ;;  %s926_s7 = sshll.u32 %s1017_s6, 4  ;;  %s927_s7 = int_to_ptr.vmem [resolvable:$false] %s926_s7 }
  0x1e   : > { %410 = vmatpush1.msra.mxu0 %v330_v4  ;;  %844 = vmatpush1.msra.mxu1 %v330_v4  ;;  %v318_v10 = vld [vmem:[%s1117_s17 + $0x40] sm:$0xff]  ;;  %v319_v12 = vld [vmem:[%s1117_s17 + $0x48] sm:$0xff]  ;;  %v313_v15 = vld [vmem:[%s1117_s17 + $0x18] sm:$0xff]  ;;  %s928_s8 = scalar_lea.vmem %s927_s7, 8192  ;;  %p929_p4 = scmp.lt.s32.totalorder %s1206_s13, %s927_s7 }
  0x1f   : > { %411 = vmatprep.subr.mxu0 %v329_v5  ;;  %841 = vmatprep.subr.mxu1 %v329_v5  ;;  %v321_v16 = vld [vmem:[%s1117_s17 + $0x58] sm:$0xff]  ;;  %v314_v17 = vld [vmem:[%s1117_s17 + $0x20] sm:$0xff]  ;;  %v315_v19 = vld [vmem:[%s1117_s17 + $0x28] sm:$0xff]  ;;  %p924_p1 = pnand %p923_p0, %p1086_p3  ;;  %p930_p5 = scmp.lt.s32.totalorder %s928_s8, %s922_s5 }
  0x20   : > { %412 = vmatpush1.msra.mxu0 %v328_v6  ;;  %845 = vmatpush1.msra.mxu1 %v328_v6  ;;  %v322_v18 = vld [vmem:[%s1117_s17 + $0x60] sm:$0xff]  ;;  %v323_v20 = vld [vmem:[%s1117_s17 + $0x68] sm:$0xff]  ;;  %v316_v21 = vld [vmem:[%s1117_s17 + $0x30] sm:$0xff] }
  0x21   : > { %413 = vmatprep.subr.mxu0 %v327_v7  ;;  %842 = vmatprep.subr.mxu1 %v327_v7  ;;  %v324_v22 = vld [vmem:[%s1117_s17 + $0x70] sm:$0xff]  ;;  %v317_v23 = vld [vmem:[%s1117_s17 + $0x38] sm:$0xff]  ;;  %p925_p2 = pneg %p924_p1  ;;  %p931_p6 = por %p930_p5, %p929_p4 }
  0x22   : > { %414 = vmatpush1.msra.mxu0 %v326_v8  ;;  %846 = vmatpush1.msra.mxu1 %v326_v8  ;;  %v325_v24 = vld [vmem:[%s1117_s17 + $0x78] sm:$0xff] }
  0x23   : > { %815 = vmatmul.mubr.msk.f32.vlgmr.msra.gmra.mxu0 %vm334_vm0, %v310_v9  ;;  %823 = vmatmul.mubr.msk.f32.vlgmr.msra.gmra.mxu1 %vm334_vm0, %v318_v10  ;;  %p932_p7 = pnand %p931_p6, %p925_p2 }
  0x24   : > { %453 = vmatprep.mubr.f32.mxu0 %v1016_v0  ;;  %501 = vmatprep.mubr.f32.mxu1 %v1016_v0 }
  0x27   : > { %816 = vmatmul.mubr.msk.f32.gmra.mxu0 %vm334_vm0, %v311_v11  ;;  %824 = vmatmul.mubr.msk.f32.gmra.mxu1 %vm334_vm0, %v319_v12 }
  0x28   : > { %459 = vmatprep.mubr.f32.mxu0 %v1016_v0  ;;  %507 = vmatprep.mubr.f32.mxu1 %v1016_v0 }
  0x2b   : > { %817 = vmatmul.mubr.msk.f32.gmra.mxu0 %vm334_vm0, %v312_v13  ;;  %825 = vmatmul.mubr.msk.f32.gmra.mxu1 %vm334_vm0, %v320_v14 }
  0x2c   : > { %465 = vmatprep.mubr.f32.mxu0 %v1016_v0  ;;  %513 = vmatprep.mubr.f32.mxu1 %v1016_v0 }
  0x2f   : > { %818 = vmatmul.mubr.msk.f32.gmra.mxu0 %vm334_vm0, %v313_v15  ;;  %826 = vmatmul.mubr.msk.f32.gmra.mxu1 %vm334_vm0, %v321_v16 }
  0x30   : > { %471 = vmatprep.mubr.f32.mxu0 %v1016_v0  ;;  %519 = vmatprep.mubr.f32.mxu1 %v1016_v0 }
  0x33   : > { %819 = vmatmul.mubr.msk.f32.gmra.mxu0 %vm334_vm0, %v314_v17  ;;  %827 = vmatmul.mubr.msk.f32.gmra.mxu1 %vm334_vm0, %v322_v18 }
  0x34   : > { %477 = vmatprep.mubr.f32.mxu0 %v1016_v0  ;;  %525 = vmatprep.mubr.f32.mxu1 %v1016_v0 }
  0x37   : > { %820 = vmatmul.mubr.msk.f32.gmra.mxu0 %vm334_vm0, %v315_v19  ;;  %828 = vmatmul.mubr.msk.f32.gmra.mxu1 %vm334_vm0, %v323_v20 }
  0x38   : > { %483 = vmatprep.mubr.f32.mxu0 %v1016_v0  ;;  %531 = vmatprep.mubr.f32.mxu1 %v1016_v0 }
  0x3b   : > { %821 = vmatmul.mubr.msk.f32.gmra.mxu0 %vm334_vm0, %v316_v21  ;;  %829 = vmatmul.mubr.msk.f32.gmra.mxu1 %vm334_vm0, %v324_v22 }
  0x3c   : > { %489 = vmatprep.mubr.f32.mxu0 %v1016_v0  ;;  %537 = vmatprep.mubr.f32.mxu1 %v1016_v0 }
  0x3f   : > { %822 = vmatmul.mubr.msk.f32.gmra.mxu0 %vm334_vm0, %v317_v23  ;;  %830 = vmatmul.mubr.msk.f32.gmra.mxu1 %vm334_vm0, %v325_v24 }
  0xe3   : > { %v449_v25 = vpop.f32.mrf.mxu0  ;;  %v497_v26 = vpop.f32.mrf.mxu1 }
  0xe4   : > { %643 = vst [vmem:[%s1168_s24] sm:$0xff] %v449_v25  ;;  %659 = vst [vmem:[%s1168_s24 + $0x80] sm:$0xff] %v497_v26 }
  0xe5   : > { %v451_v27 = vpop.f32.mrf.mxu0  ;;  %v499_v28 = vpop.f32.mrf.mxu1 }
  0xe6   : > { %644 = vst [vmem:[%s1168_s24 + $0x8] sm:$0xff] %v451_v27  ;;  %660 = vst [vmem:[%s1168_s24 + $0x88] sm:$0xff] %v499_v28 }
  0xe7   : > { %v455_v29 = vpop.f32.mrf.mxu0  ;;  %v503_v30 = vpop.f32.mrf.mxu1 }
  0xe8   : > { %645 = vst [vmem:[%s1168_s24 + $0x10] sm:$0xff] %v455_v29  ;;  %661 = vst [vmem:[%s1168_s24 + $0x90] sm:$0xff] %v503_v30 }
  0xe9   : > { %v457_v31 = vpop.f32.mrf.mxu0  ;;  %v505_v32 = vpop.f32.mrf.mxu1 }
  0xea   : > { %646 = vst [vmem:[%s1168_s24 + $0x18] sm:$0xff] %v457_v31  ;;  %662 = vst [vmem:[%s1168_s24 + $0x98] sm:$0xff] %v505_v32 }
  0xeb   : > { %v461_v33 = vpop.f32.mrf.mxu0  ;;  %v509_v34 = vpop.f32.mrf.mxu1 }
  0xec   : > { %647 = vst [vmem:[%s1168_s24 + $0x20] sm:$0xff] %v461_v33  ;;  %663 = vst [vmem:[%s1168_s24 + $0xa0] sm:$0xff] %v509_v34 }
  0xed   : > { %v463_v35 = vpop.f32.mrf.mxu0  ;;  %v511_v36 = vpop.f32.mrf.mxu1 }
  0xee   : > { %648 = vst [vmem:[%s1168_s24 + $0x28] sm:$0xff] %v463_v35  ;;  %664 = vst [vmem:[%s1168_s24 + $0xa8] sm:$0xff] %v511_v36 }
  0xef   : > { %v467_v37 = vpop.f32.mrf.mxu0  ;;  %v515_v38 = vpop.f32.mrf.mxu1 }
  0xf0   : > { %649 = vst [vmem:[%s1168_s24 + $0x30] sm:$0xff] %v467_v37  ;;  %665 = vst [vmem:[%s1168_s24 + $0xb0] sm:$0xff] %v515_v38 }
  0xf1   : > { %v469_v39 = vpop.f32.mrf.mxu0  ;;  %v517_v40 = vpop.f32.mrf.mxu1 }
  0xf2   : > { %650 = vst [vmem:[%s1168_s24 + $0x38] sm:$0xff] %v469_v39  ;;  %666 = vst [vmem:[%s1168_s24 + $0xb8] sm:$0xff] %v517_v40 }
  0xf3   : > { %v473_v41 = vpop.f32.mrf.mxu0  ;;  %v521_v42 = vpop.f32.mrf.mxu1 }
  0xf4   : > { %651 = vst [vmem:[%s1168_s24 + $0x40] sm:$0xff] %v473_v41  ;;  %667 = vst [vmem:[%s1168_s24 + $0xc0] sm:$0xff] %v521_v42 }
  0xf5   : > { %v475_v43 = vpop.f32.mrf.mxu0  ;;  %v523_v44 = vpop.f32.mrf.mxu1 }
  0xf6   : > { %652 = vst [vmem:[%s1168_s24 + $0x48] sm:$0xff] %v475_v43  ;;  %668 = vst [vmem:[%s1168_s24 + $0xc8] sm:$0xff] %v523_v44 }
  0xf7   : > { %v479_v45 = vpop.f32.mrf.mxu0  ;;  %v527_v46 = vpop.f32.mrf.mxu1 }
  0xf8   : > { %653 = vst [vmem:[%s1168_s24 + $0x50] sm:$0xff] %v479_v45  ;;  %669 = vst [vmem:[%s1168_s24 + $0xd0] sm:$0xff] %v527_v46 }
  0xf9   : > { %v481_v47 = vpop.f32.mrf.mxu0  ;;  %v529_v48 = vpop.f32.mrf.mxu1 }
  0xfa   : > { %654 = vst [vmem:[%s1168_s24 + $0x58] sm:$0xff] %v481_v47  ;;  %670 = vst [vmem:[%s1168_s24 + $0xd8] sm:$0xff] %v529_v48 }
  0xfb   : > { %v485_v49 = vpop.f32.mrf.mxu0  ;;  %v533_v50 = vpop.f32.mrf.mxu1 }
  0xfc   : > { %655 = vst [vmem:[%s1168_s24 + $0x60] sm:$0xff] %v485_v49  ;;  %671 = vst [vmem:[%s1168_s24 + $0xe0] sm:$0xff] %v533_v50 }
  0xfd   : > { %v487_v51 = vpop.f32.mrf.mxu0  ;;  %v535_v52 = vpop.f32.mrf.mxu1 }
  0xfe   : > { %656 = vst [vmem:[%s1168_s24 + $0x68] sm:$0xff] %v487_v51  ;;  %672 = vst [vmem:[%s1168_s24 + $0xe8] sm:$0xff] %v535_v52 }
  0xff   : > { %v491_v53 = vpop.f32.mrf.mxu0  ;;  %v539_v54 = vpop.f32.mrf.mxu1 }
 0x100   : > { %657 = vst [vmem:[%s1168_s24 + $0x70] sm:$0xff] %v491_v53  ;;  %673 = vst [vmem:[%s1168_s24 + $0xf0] sm:$0xff] %v539_v54 }
 0x101   : > { %v493_v55 = vpop.f32.mrf.mxu0  ;;  %v541_v56 = vpop.f32.mrf.mxu1 }
 0x102   : > { %658 = vst [vmem:[%s1168_s24 + $0x78] sm:$0xff] %v493_v55  ;;  %674 = vst [vmem:[%s1168_s24 + $0xf8] sm:$0xff] %v541_v56 }
 0x103   : > { %935 = shalt.err (!%p932_p7)
}
 0x104   : > { %s936_s17 = scalar_lea.hbm %s1204_s3, 4096  ;;  %s940_s24 = scalar_lea.hbm %s1267_s2, 24576 }
 0x105   : > { %p937_p9 = scmp.ne.s32.totalorder %s1204_s3, %s936_s17  ;;  %p941_p12 = scmp.lt.s32.totalorder %s1204_s3, %s1267_s2 }
 0x106   : > { %p942_p13 = scmp.lt.s32.totalorder %s940_s24, %s936_s17 }
 0x107   : > { %p938_p10 = pnand %p937_p9, %p1086_p3 }
 0x108   : > { %p943_p0 = por %p942_p13, %p941_p12 }
 0x109   : > { %p939_p11 = pneg %p938_p10 }
 0x10b   : > { %p944_p1 = pnand %p943_p0, %p939_p11 }
 0x10d   : > { %947 = shalt.err (!%p944_p1)
}
 0x10e   : > { %s1018_s28 = smov 256   ;;  %s1019_s12 = smov 16  }
 0x10f   : > { %848 = dma.vmem_to_hbm [thread:$0]  (%p1086_p3), %s1206_s13, 4096, %s1204_s3, %s1214_s4, %s1018_s28, %s1018_s28, %s1019_s12  }
 0x110 PF: > { %p854_p2 = scmp.ge.s32.totalorder %s1014_s16, 2  ;;  %s709_s29 = sand.u32 1, %s986_s9  }
 0x111   : > { %s710_s30 = scalar_lea.sflag [#allocation4], %s709_s29 }
 0x112   : > { %p851_p4 = pnand %p854_p2, %p1095_p8 }
 0x114   : > { %p852_p5 = pneg %p851_p4 }
 0x116   : > { %981 = dma.done.wait (%p852_p5), %s710_s30, 4096  }
 0x117   : > { %983 = vsyncadd (%p852_p5), %s710_s30, 4294963200  ;;  %s15_s16 = sadd.s32 1, %s1014_s16   ;;  %s1270_s9 = smov %s990_s10 }
 0x118   : > { %p12_p6 = scmp.ge.s32.totalorder %s15_s16, 8   ;;  %s1271_s10 = smov %s994_s11 }
 0x119   : > { %s1272_s11 = smov %s1104_s27  ;;  %s1273_s12 = smov %s1006_s14 }
 0x11a   : > { %s1274_s13 = smov %s1010_s15  ;;  %s1275_s14 = smov %s1278_s19 }
 0x11b   : > { %s1276_s15 = smov %s1282_s20  ;;  %14 = sbr.rel (!%p12_p6) target bundleno = 5 (0x5), region = 74 }
 0x120   :  { %715 = vsyncpa [#allocation4], 1 }
 0x121   :  { %717 = vsyncpa [#allocation4 + $0x1], 1 }

</bundles_post_ra>
